<compile_context>
chip_gen: v6e
topology: v6e:2x2x1
jax: 0.10.0
libtpu: 0.0.40
codegen_flags: <defaults>
</compile_context>

<pallas_src>
import functools
import math

import numpy as np

import jax
import jax.numpy as jnp
from jax import lax
from jax.experimental import pallas as pl
from jax.experimental.pallas import tpu as pltpu


def _conv1d_gn_mish_kernel(x_ref, w_ref, p_ref, sel_ref, selt_ref, mask_ref,
                           g_ref, gt_ref, o_ref, *,
                           K, T, T_pad, Bt, n_groups, group_size, eps, fused):
    # x_ref    : (C_in_pad, Nt)  batch-packed input tile, Nt = Bt*T_pad  (compute dtype)
    # w_ref    : fused  -> (C_out, K*C_in_pad)  flattened taps
    #            accum  -> (K, C_out, C_in_pad) per-tap weights            (compute dtype)
    # p_ref    : (C_out, 3) f32, columns = (conv bias, gn gamma, gn beta)
    # sel_ref  : (Bt, Nt)  f32  local-batch -> lane one-hot (0 on padded time steps)
    # selt_ref : (Nt, Bt)  f32  transposed copy (lane -> local-batch reduction)
    # mask_ref : (K, Nt)   compute dtype, per-tap edge/segment validity mask
    # g_ref    : (n_groups, C_out) f32 group -> channel one-hot
    # gt_ref   : (C_out, n_groups) f32 transposed copy
    # o_ref    : (C_out, Nt)
    pad = K // 2
    Nt = Bt * T_pad
    x = x_ref[...]
    lane_aligned = (Nt % 128 == 0)

    def tap(k):
        d = k - pad
        if d == 0:
            return x
        if lane_aligned:
            s = pltpu.roll(x, shift=(-d) % Nt, axis=1)          # XLU rotate (free slot)
        else:
            # tiny unaligned fallback block: plain slice + zero fill
            if d > 0:
                s = jnp.concatenate(
                    [x[:, d:], jnp.zeros((x.shape[0], d), x.dtype)], axis=1)
            else:
                s = jnp.concatenate(
                    [jnp.zeros((x.shape[0], -d), x.dtype), x[:, :Nt + d]], axis=1)
        return s * mask_ref[k:k + 1, :]                         # zero cross-batch / OOB taps

    # ---- Conv1d (bias folded into the GroupNorm affine below) ----
    if fused:
        xcol = jnp.concatenate([tap(k) for k in range(K)], axis=0)   # (K*C_in_pad, Nt)
        acc = jnp.dot(w_ref[...], xcol, preferred_element_type=jnp.float32)
    else:
        acc = jnp.dot(w_ref[0], tap(0), preferred_element_type=jnp.float32)
        for k in range(1, K):
            acc += jnp.dot(w_ref[k], tap(k), preferred_element_type=jnp.float32)
    # acc: (C_out, Nt) f32, conv bias NOT added.

    # ---- GroupNorm (per batch element); reduce the lane axis FIRST ----
    sel = sel_ref[...]                                           # (Bt, Nt)
    selT = selt_ref[...]                                         # (Nt, Bt)
    bias = p_ref[:, 0:1]                                         # (C_out, 1)
    gamma = p_ref[:, 1:2]
    beta = p_ref[:, 2:3]

    bsum = jnp.dot(acc, selT, preferred_element_type=jnp.float32)        # (C_out, Bt)
    bsumsq = jnp.dot(acc * acc, selT, preferred_element_type=jnp.float32)
    # analytic conv-bias correction (bias constant over time, varies per channel)
    bsumsq = bsumsq + (2.0 * bias) * bsum + (bias * bias) * float(T)
    bsum = bsum + bias * float(T)

    G = g_ref[...]                                               # (n_groups, C_out)
    GT = gt_ref[...]                                             # (C_out, n_groups)
    inv_n = 1.0 / float(group_size * T)
    g_mean = jnp.dot(G, bsum, preferred_element_type=jnp.float32) * inv_n     # (n_groups, Bt)
    g_msq = jnp.dot(G, bsumsq, preferred_element_type=jnp.float32) * inv_n
    g_var = jnp.maximum(g_msq - g_mean * g_mean, 0.0)   # clamp E[x^2]-E[x]^2 cancellation
    g_rstd = lax.rsqrt(g_var + eps)

    mean_c = jnp.dot(GT, g_mean, preferred_element_type=jnp.float32)          # (C_out, Bt)
    rstd_c = jnp.dot(GT, g_rstd, preferred_element_type=jnp.float32)
    scale_c = gamma * rstd_c
    shift_c = beta + (bias - mean_c) * scale_c
    scale = jnp.dot(scale_c, sel, preferred_element_type=jnp.float32)         # (C_out, Nt)
    shift = jnp.dot(shift_c, sel, preferred_element_type=jnp.float32)
    y = acc * scale + shift

    # ---- Mish: y * tanh(softplus(y)), one EUP exp + EUP approx reciprocal ----
    # tanh(log(1+e^y)) == w/(w+2) with w = e^y*(e^y+2); clamp so e^y can't overflow.
    e = jnp.exp(jnp.minimum(y, 20.0))
    wv = e * (e + 2.0)
    den = wv + 2.0
    r = pl.reciprocal(den, approx=True)
    r = r * (2.0 - den * r)                                      # one Newton refinement
    o_ref[...] = (y * (wv * r)).astype(o_ref.dtype)


def _target_lanes(C_in_pad, C_out):
    """Lane-block budget per grid step, scaled by the chip's VMEM capacity."""
    try:
        vmem = int(pltpu.get_tpu_info().vmem_capacity_bytes)
    except Exception:
        vmem = 64 * 1024 * 1024
    tgt = 1024 if vmem >= (100 << 20) else 512      # v5e/v6e 128 MiB vs v7x 64 MiB
    if max(C_in_pad, C_out) >= 512:
        tgt = min(tgt, 512)
    return tgt


def _choose_tiling(B, T, target_lanes):
    """Whole batch elements per grid step; optionally pad T to a lane-friendly T_pad.

    Preference order:
      1) unpadded, Bt*T a multiple of 128 (lane-dense, unmasked stores),
      2) T padded to the smallest T_pad (<= 2*T) making Bt*T_pad a 128 multiple,
      3) one full-axis block (legal full-dim BlockSpec) for small B*T,
      4) one batch element per step with T padded to a 128 multiple.
    Prefers >= 2 grid steps so both v7x TensorCores get work.
    """
    divs = [d for d in range(1, B + 1) if B % d == 0]

    def pick(cands):
        multi = [c for c in cands if B // c[0] >= 2]
        pool = multi if multi else cands
        return max(pool, key=lambda c: (c[0] * c[1], -c[1]))

    exact = [(d, T) for d in divs if (d * T) % 128 == 0 and d * T <= target_lanes]
    if exact:
        return pick(exact)
    padded = []
    for d in divs:
        g = 128 // math.gcd(d, 128)
        t_pad = ((T + g - 1) // g) * g
        if t_pad <= 2 * T and d * t_pad <= target_lanes:
            padded.append((d, t_pad))
    if padded:
        return pick(padded)
    if B * T <= max(2 * target_lanes, 2048):
        return B, T           # single full-dim block; small enough not to blow VMEM
    # TODO(synk): halo'd T-tiling + cross-step GroupNorm stats for very long horizons.
    return 1, ((T + 127) // 128) * 128


def _vmem_limit(C_in_pad, C_out, K, Nt, cdt, odt, fused):
    """Scoped-VMEM limit derived from actual tile sizes, capped by chip capacity."""
    ci, co = cdt.itemsize, odt.itemsize
    lanes = max(Nt, 128)
    x_t = C_in_pad * lanes * ci
    o_t = C_out * lanes * co
    w_t = K * C_in_pad * C_out * ci
    aux = (C_out * 128 + 16 * lanes + lanes * 128 // 8) * 4 + 16 * lanes * ci
    tmp = 4 * C_out * lanes * 4
    tmp += K * C_in_pad * lanes * ci if fused else C_in_pad * lanes * ci
    need = 2 * (x_t + o_t + w_t + aux) + tmp
    try:
        cap = int(pltpu.get_tpu_info().vmem_capacity_bytes) * 3 // 4
    except Exception:
        cap = 48 * 1024 * 1024
    return int(min(max(2 * need, 32 * 1024 * 1024), cap))


def conv1d_block(x, w, b, gamma, beta, *, n_groups=8, eps=1e-5,
                 compute_dtype=jnp.bfloat16, out_dtype=None,
                 conv_path="auto", block_batch=None):
    """Fused Conv1d(stride 1, padding=K//2) -> GroupNorm(n_groups) -> Mish.

    x: (B, C_in, T); w: (C_out, C_in, K); b/gamma/beta: (C_out,).
    Returns (B, C_out, T) in out_dtype (default x.dtype). MXU operands use
    `compute_dtype` (bf16 by default); accumulation and the epilogue are f32.
    """
    B, C_in, T = x.shape
    C_out, C_in_w, K = w.shape
    assert C_in_w == C_in, "weight C_in mismatch"
    assert K % 2 == 1, "kernel expects odd kernel_size (PyTorch padding=K//2)"
    assert C_out % n_groups == 0, "C_out must be divisible by n_groups"
    group_size = C_out // n_groups
    if compute_dtype is None:
        compute_dtype = x.dtype
    if out_dtype is None:
        out_dtype = x.dtype
    cdt = jnp.dtype(compute_dtype)
    odt = jnp.dtype(out_dtype)

    # Pad C_in to the sublane packing multiple (8 rows f32 / 16 rows bf16) so the
    # in-kernel tap stacking / contraction is layout-aligned.
    pack = 8 * (4 // cdt.itemsize)
    C_in_pad = ((C_in + pack - 1) // pack) * pack

    if block_batch is None:
        Bt, T_pad = _choose_tiling(B, T, _target_lanes(C_in_pad, C_out))
    else:
        assert B % block_batch == 0, "block_batch must divide B"
        assert (block_batch * T) % 128 == 0 or block_batch == B, \
            "block_batch*T must be a multiple of 128 (or block_batch == B)"
        Bt, T_pad = block_batch, T
    Nt = Bt * T_pad
    grid = (B // Bt,)
    pad_k = K // 2

    fused = {"auto": (K * C_in_pad <= 256), "im2col": True, "accum": False}[conv_path]

    # ---- layout plumbing (wrapper side) ----
    # TODO(synk): fold the x repack / output transpose into the kernel (3-D blocks
    # of the original NCW layout) if profiling shows unfused HBM transpose passes
    # dominate for memory-bound shapes.
    x_c = x.astype(compute_dtype)
    if C_in_pad > C_in or T_pad > T:
        x_c = jnp.pad(x_c, ((0, 0), (0, C_in_pad - C_in), (0, T_pad - T)))
    x_flat = jnp.transpose(x_c, (1, 0, 2)).reshape(C_in_pad, B * T_pad)

    w_p = jnp.pad(w, ((0, 0), (0, C_in_pad - C_in), (0, 0)))       # (C_out, C_in_pad, K)
    if fused:
        w_in = jnp.transpose(w_p, (0, 2, 1)).reshape(C_out, K * C_in_pad)
        w_spec = pl.BlockSpec((C_out, K * C_in_pad), lambda i: (0, 0))
    else:
        w_in = jnp.transpose(w_p, (2, 0, 1))                        # (K, C_out, C_in_pad)
        w_spec = pl.BlockSpec((K, C_out, C_in_pad), lambda i: (0, 0, 0))
    w_in = w_in.astype(compute_dtype)

    params = jnp.stack([b, gamma, beta], axis=1).astype(jnp.float32)   # (C_out, 3)

    # Hoisted constants (built once at trace time, DMA'd once, stay VMEM resident).
    tloc = np.arange(Nt) % T_pad
    seg = np.arange(Nt) // T_pad
    sel_np = ((seg[None, :] == np.arange(Bt)[:, None]) & (tloc[None, :] < T))
    sel_h = jnp.asarray(sel_np, jnp.float32)                           # (Bt, Nt)
    selt_h = jnp.asarray(sel_np.T, jnp.float32)                        # (Nt, Bt)
    mask_np = np.stack([((tloc + (k - pad_k)) >= 0) & ((tloc + (k - pad_k)) < T_pad)
                        for k in range(K)])
    mask_h = jnp.asarray(mask_np, cdt)                                 # (K, Nt)
    G_np = (np.arange(C_out)[None, :] // group_size) == np.arange(n_groups)[:, None]
    g_h = jnp.asarray(G_np, jnp.float32)                               # (n_groups, C_out)
    gt_h = jnp.asarray(G_np.T, jnp.float32)                            # (C_out, n_groups)

    kernel = functools.partial(
        _conv1d_gn_mish_kernel, K=K, T=T, T_pad=T_pad, Bt=Bt,
        n_groups=n_groups, group_size=group_size, eps=float(eps), fused=fused)

    out_flat = pl.pallas_call(
        kernel,
        out_shape=jax.ShapeDtypeStruct((C_out, B * T_pad), out_dtype),
        grid=grid,
        in_specs=[
            pl.BlockSpec((C_in_pad, Nt), lambda i: (0, i)),
            w_spec,
            pl.BlockSpec((C_out, 3), lambda i: (0, 0)),
            pl.BlockSpec((Bt, Nt), lambda i: (0, 0)),
            pl.BlockSpec((Nt, Bt), lambda i: (0, 0)),
            pl.BlockSpec((K, Nt), lambda i: (0, 0)),
            pl.BlockSpec((n_groups, C_out), lambda i: (0, 0)),
            pl.BlockSpec((C_out, n_groups), lambda i: (0, 0)),
        ],
        out_specs=pl.BlockSpec((C_out, Nt), lambda i: (0, i)),
        compiler_params=pltpu.CompilerParams(
            dimension_semantics=("parallel",),
            vmem_limit_bytes=_vmem_limit(C_in_pad, C_out, K, Nt, cdt, odt, fused)),
    )(x_flat, w_in, params, sel_h, selt_h, mask_h, g_h, gt_h)

    # Back to PyTorch NCW layout, dropping any padded horizon positions.
    out = jnp.transpose(out_flat.reshape(C_out, B, T_pad), (1, 0, 2))
    if T_pad > T:
        out = out[:, :, :T]
    return out


def _reference(x, w, b, gamma, beta, n_groups=8, eps=1e-5):
    """Pure-JAX reference matching the PyTorch module semantics."""
    K = w.shape[-1]
    y = lax.conv_general_dilated(
        x, w, window_strides=(1,), padding=[(K // 2, K // 2)],
        dimension_numbers=('NCH', 'OIH', 'NCH'),
        precision=lax.Precision.HIGHEST)
    y = y + b[None, :, None]
    B, C, T = y.shape
    yg = y.reshape(B, n_groups, -1)
    mean = yg.mean(-1, keepdims=True)
    var = yg.var(-1, keepdims=True)
    yn = ((yg - mean) / jnp.sqrt(var + eps)).reshape(B, C, T)
    yn = yn * gamma[None, :, None] + beta[None, :, None]
    return yn * jnp.tanh(jax.nn.softplus(yn))


def _make_inputs(key, B, C_in, C_out, T, K):
    k_x, k_w, k_b, k_g, k_be = jax.random.split(key, 5)
    x = jax.random.normal(k_x, (B, C_in, T), jnp.float32)
    fan_in = C_in * K
    bound = 1.0 / (fan_in ** 0.5)
    w = jax.random.uniform(k_w, (C_out, C_in, K), jnp.float32, -bound, bound)
    b = jax.random.uniform(k_b, (C_out,), jnp.float32, -bound, bound)
    gamma = 1.0 + 0.1 * jax.random.normal(k_g, (C_out,), jnp.float32)
    beta = 0.1 * jax.random.normal(k_be, (C_out,), jnp.float32)
    return x, w, b, gamma, beta


if __name__ == "__main__":
    keys = jax.random.split(jax.random.PRNGKey(0), 4)

    # 1) Tiny module-scale shape, default bf16 MXU operands, single full block.
    x, w, b, g, be = _make_inputs(keys[0], B=2, C_in=4, C_out=16, T=16, K=3)
    out = jax.block_until_ready(conv1d_block(x, w, b, g, be, n_groups=8))
    ref = _reference(x, w, b, g, be, n_groups=8)
    assert out.shape == (2, 16, 16)
    assert jnp.allclose(out, ref, atol=5e-2, rtol=5e-2), "bf16 small-shape mismatch"

    # 1b) Same shape with f32 MXU operands -> tight tolerance.
    out_f = jax.block_until_ready(
        conv1d_block(x, w, b, g, be, n_groups=8, compute_dtype=jnp.float32))
    assert jnp.allclose(out_f, ref, atol=2e-3, rtol=2e-3), "f32 small-shape mismatch"

    # 2) Multi-step lane-dense grid (Bt=2 -> 128-lane blocks), bf16, roll path.
    x2, w2, b2, g2, be2 = _make_inputs(keys[1], B=4, C_in=8, C_out=32, T=64, K=5)
    out2 = jax.block_until_ready(conv1d_block(x2, w2, b2, g2, be2, n_groups=8))
    ref2 = _reference(x2, w2, b2, g2, be2, n_groups=8)
    assert out2.shape == (4, 32, 64)
    assert jnp.allclose(out2, ref2, atol=5e-2, rtol=5e-2), "bf16 multi-block mismatch"

    # 3) Accumulated-matmul conv path (large-C_in style), f32 for a tight check.
    x3, w3, b3, g3, be3 = _make_inputs(keys[2], B=2, C_in=32, C_out=32, T=64, K=3)
    out3 = jax.block_until_ready(
        conv1d_block(x3, w3, b3, g3, be3, n_groups=8,
                     compute_dtype=jnp.float32, conv_path="accum"))
    ref3 = _reference(x3, w3, b3, g3, be3, n_groups=8)
    assert jnp.allclose(out3, ref3, atol=2e-3, rtol=2e-3), "accum conv path mismatch"

    # 4) Non-128-aligned horizon -> padded-T lane blocks + masked GroupNorm stats.
    x4, w4, b4, g4, be4 = _make_inputs(keys[3], B=4, C_in=4, C_out=16, T=100, K=3)
    out4 = jax.block_until_ready(conv1d_block(x4, w4, b4, g4, be4, n_groups=8))
    ref4 = _reference(x4, w4, b4, g4, be4, n_groups=8)
    assert out4.shape == (4, 16, 100)
    assert jnp.allclose(out4, ref4, atol=5e-2, rtol=5e-2), "padded-T path mismatch"

    print("KERNEL_OK")
</pallas_src>

<mosaic_0001>
module attributes {stable_mosaic.version = 11 : i64} {
  func.func @_conv1d_gn_mish_kernel(%arg0: i32, %arg1: memref<16x32xbf16, #tpu.memory_space<vmem>>, %arg2: memref<16x48xbf16, #tpu.memory_space<vmem>>, %arg3: memref<16x3xf32, #tpu.memory_space<vmem>>, %arg4: memref<2x32xf32, #tpu.memory_space<vmem>>, %arg5: memref<32x2xf32, #tpu.memory_space<vmem>>, %arg6: memref<3x32xbf16, #tpu.memory_space<vmem>>, %arg7: memref<8x16xf32, #tpu.memory_space<vmem>>, %arg8: memref<16x8xf32, #tpu.memory_space<vmem>>, %arg9: memref<16x32xf32, #tpu.memory_space<vmem>>) attributes {dimension_semantics = [#tpu.dimension_semantics<parallel>], iteration_bounds = array<i64: 1>, scalar_prefetch = 0 : i64, scratch_operands = 0 : i64, tpu.core_type = #tpu.core_type<tc>, window_params = [{transform_indices = @transform_0, window_bounds = array<i64: 16, 32>}, {pipeline_mode = #tpu.pipeline_mode<synchronous>, transform_indices = @transform_1, window_bounds = array<i64: 16, 48>}, {pipeline_mode = #tpu.pipeline_mode<synchronous>, transform_indices = @transform_2, window_bounds = array<i64: 16, 3>}, {pipeline_mode = #tpu.pipeline_mode<synchronous>, transform_indices = @transform_3, window_bounds = array<i64: 2, 32>}, {pipeline_mode = #tpu.pipeline_mode<synchronous>, transform_indices = @transform_4, window_bounds = array<i64: 32, 2>}, {pipeline_mode = #tpu.pipeline_mode<synchronous>, transform_indices = @transform_5, window_bounds = array<i64: 3, 32>}, {pipeline_mode = #tpu.pipeline_mode<synchronous>, transform_indices = @transform_6, window_bounds = array<i64: 8, 16>}, {pipeline_mode = #tpu.pipeline_mode<synchronous>, transform_indices = @transform_7, window_bounds = array<i64: 16, 8>}, {transform_indices = @transform_8, window_bounds = array<i64: 16, 32>}]} {
    %c0 = arith.constant 0 : index
    %c0_0 = arith.constant 0 : index
    %0 = vector.load %arg1[%c0, %c0_0] : memref<16x32xbf16, #tpu.memory_space<vmem>>, vector<16x32xbf16>
    %cst = arith.constant 0.000000e+00 : bf16
    %1 = vector.broadcast %cst : bf16 to vector<16x1xbf16>
    %2 = vector.extract_strided_slice %0 {offsets = [0, 0], sizes = [16, 31], strides = [1, 1]} : vector<16x32xbf16> to vector<16x31xbf16>
    %3 = tpu.concatenate %1, %2 in 1 : vector<16x1xbf16>, vector<16x31xbf16> -> vector<16x32xbf16>
    %c0_1 = arith.constant 0 : index
    %c0_2 = arith.constant 0 : index
    %4 = vector.load %arg6[%c0_1, %c0_2] : memref<3x32xbf16, #tpu.memory_space<vmem>>, vector<1x32xbf16>
    %5 = vector.broadcast %4 : vector<1x32xbf16> to vector<16x32xbf16>
    %6 = arith.mulf %3, %5 : vector<16x32xbf16>
    %7 = vector.extract_strided_slice %0 {offsets = [0, 1], sizes = [16, 31], strides = [1, 1]} : vector<16x32xbf16> to vector<16x31xbf16>
    %cst_3 = arith.constant 0.000000e+00 : bf16
    %8 = vector.broadcast %cst_3 : bf16 to vector<16x1xbf16>
    %9 = tpu.concatenate %7, %8 in 1 : vector<16x31xbf16>, vector<16x1xbf16> -> vector<16x32xbf16>
    %c2 = arith.constant 2 : index
    %c0_4 = arith.constant 0 : index
    %10 = vector.load %arg6[%c2, %c0_4] : memref<3x32xbf16, #tpu.memory_space<vmem>>, vector<1x32xbf16>
    %11 = vector.broadcast %10 : vector<1x32xbf16> to vector<16x32xbf16>
    %12 = arith.mulf %9, %11 : vector<16x32xbf16>
    %13 = tpu.concatenate %6, %0, %12 in 0 : vector<16x32xbf16>, vector<16x32xbf16>, vector<16x32xbf16> -> vector<48x32xbf16>
    %c0_5 = arith.constant 0 : index
    %c0_6 = arith.constant 0 : index
    %14 = vector.load %arg2[%c0_5, %c0_6] : memref<16x48xbf16, #tpu.memory_space<vmem>>, vector<16x48xbf16>
    %cst_7 = arith.constant dense<0.000000e+00> : vector<16x32xf32>
    %15 = tpu.matmul %14, %13, %cst_7 {dimension_numbers = #tpu.dot_dimension_numbers<[1], [0], [0], [1], [0, 0, 1, 1], [], []>} : vector<16x48xbf16>, vector<48x32xbf16>, vector<16x32xf32> -> vector<16x32xf32>
    %c0_8 = arith.constant 0 : index
    %c0_9 = arith.constant 0 : index
    %16 = vector.load %arg4[%c0_8, %c0_9] : memref<2x32xf32, #tpu.memory_space<vmem>>, vector<2x32xf32>
    %c0_10 = arith.constant 0 : index
    %c0_11 = arith.constant 0 : index
    %17 = vector.load %arg5[%c0_10, %c0_11] : memref<32x2xf32, #tpu.memory_space<vmem>>, vector<32x2xf32>
    %c0_12 = arith.constant 0 : index
    %c0_13 = arith.constant 0 : index
    %18 = vector.load %arg3[%c0_12, %c0_13] : memref<16x3xf32, #tpu.memory_space<vmem>>, vector<16x1xf32>
    %c0_14 = arith.constant 0 : index
    %c1 = arith.constant 1 : index
    %19 = vector.load %arg3[%c0_14, %c1] : memref<16x3xf32, #tpu.memory_space<vmem>>, vector<16x1xf32>
    %c0_15 = arith.constant 0 : index
    %c2_16 = arith.constant 2 : index
    %20 = vector.load %arg3[%c0_15, %c2_16] : memref<16x3xf32, #tpu.memory_space<vmem>>, vector<16x1xf32>
    %cst_17 = arith.constant dense<0.000000e+00> : vector<16x2xf32>
    %21 = tpu.matmul %15, %17, %cst_17 {dimension_numbers = #tpu.dot_dimension_numbers<[1], [0], [0], [1], [0, 0, 1, 1], [], []>} : vector<16x32xf32>, vector<32x2xf32>, vector<16x2xf32> -> vector<16x2xf32>
    %22 = arith.mulf %15, %15 : vector<16x32xf32>
    %cst_18 = arith.constant dense<0.000000e+00> : vector<16x2xf32>
    %23 = tpu.matmul %22, %17, %cst_18 {dimension_numbers = #tpu.dot_dimension_numbers<[1], [0], [0], [1], [0, 0, 1, 1], [], []>} : vector<16x32xf32>, vector<32x2xf32>, vector<16x2xf32> -> vector<16x2xf32>
    %cst_19 = arith.constant 2.000000e+00 : f32
    %24 = vector.broadcast %cst_19 : f32 to vector<16x1xf32>
    %25 = arith.mulf %24, %18 : vector<16x1xf32>
    %26 = vector.broadcast %25 : vector<16x1xf32> to vector<16x2xf32>
    %27 = arith.mulf %26, %21 : vector<16x2xf32>
    %28 = arith.addf %23, %27 : vector<16x2xf32>
    %29 = arith.mulf %18, %18 : vector<16x1xf32>
    %cst_20 = arith.constant 1.600000e+01 : f32
    %30 = vector.broadcast %cst_20 : f32 to vector<16x1xf32>
    %31 = arith.mulf %29, %30 : vector<16x1xf32>
    %32 = vector.broadcast %31 : vector<16x1xf32> to vector<16x2xf32>
    %33 = arith.addf %28, %32 : vector<16x2xf32>
    %cst_21 = arith.constant 1.600000e+01 : f32
    %34 = vector.broadcast %cst_21 : f32 to vector<16x1xf32>
    %35 = arith.mulf %18, %34 : vector<16x1xf32>
    %36 = vector.broadcast %35 : vector<16x1xf32> to vector<16x2xf32>
    %37 = arith.addf %21, %36 : vector<16x2xf32>
    %c0_22 = arith.constant 0 : index
    %c0_23 = arith.constant 0 : index
    %38 = vector.load %arg7[%c0_22, %c0_23] : memref<8x16xf32, #tpu.memory_space<vmem>>, vector<8x16xf32>
    %c0_24 = arith.constant 0 : index
    %c0_25 = arith.constant 0 : index
    %39 = vector.load %arg8[%c0_24, %c0_25] : memref<16x8xf32, #tpu.memory_space<vmem>>, vector<16x8xf32>
    %cst_26 = arith.constant dense<0.000000e+00> : vector<8x2xf32>
    %40 = tpu.matmul %38, %37, %cst_26 {dimension_numbers = #tpu.dot_dimension_numbers<[1], [0], [0], [1], [0, 0, 1, 1], [], []>} : vector<8x16xf32>, vector<16x2xf32>, vector<8x2xf32> -> vector<8x2xf32>
    %cst_27 = arith.constant 3.125000e-02 : f32
    %41 = vector.broadcast %cst_27 : f32 to vector<8x2xf32>
    %42 = arith.mulf %40, %41 : vector<8x2xf32>
    %cst_28 = arith.constant dense<0.000000e+00> : vector<8x2xf32>
    %43 = tpu.matmul %38, %33, %cst_28 {dimension_numbers = #tpu.dot_dimension_numbers<[1], [0], [0], [1], [0, 0, 1, 1], [], []>} : vector<8x16xf32>, vector<16x2xf32>, vector<8x2xf32> -> vector<8x2xf32>
    %cst_29 = arith.constant 3.125000e-02 : f32
    %44 = vector.broadcast %cst_29 : f32 to vector<8x2xf32>
    %45 = arith.mulf %43, %44 : vector<8x2xf32>
    %46 = arith.mulf %42, %42 : vector<8x2xf32>
    %47 = arith.subf %45, %46 : vector<8x2xf32>
    %cst_30 = arith.constant 0.000000e+00 : f32
    %48 = vector.broadcast %cst_30 : f32 to vector<8x2xf32>
    %49 = arith.maximumf %47, %48 : vector<8x2xf32>
    %cst_31 = arith.constant 9.99999974E-6 : f32
    %50 = vector.broadcast %cst_31 : f32 to vector<8x2xf32>
    %51 = arith.addf %49, %50 : vector<8x2xf32>
    %52 = math.rsqrt %51 : vector<8x2xf32>
    %cst_32 = arith.constant dense<0.000000e+00> : vector<16x2xf32>
    %53 = tpu.matmul %39, %42, %cst_32 {dimension_numbers = #tpu.dot_dimension_numbers<[1], [0], [0], [1], [0, 0, 1, 1], [], []>} : vector<16x8xf32>, vector<8x2xf32>, vector<16x2xf32> -> vector<16x2xf32>
    %cst_33 = arith.constant dense<0.000000e+00> : vector<16x2xf32>
    %54 = tpu.matmul %39, %52, %cst_33 {dimension_numbers = #tpu.dot_dimension_numbers<[1], [0], [0], [1], [0, 0, 1, 1], [], []>} : vector<16x8xf32>, vector<8x2xf32>, vector<16x2xf32> -> vector<16x2xf32>
    %55 = vector.broadcast %19 : vector<16x1xf32> to vector<16x2xf32>
    %56 = arith.mulf %55, %54 : vector<16x2xf32>
    %57 = vector.broadcast %18 : vector<16x1xf32> to vector<16x2xf32>
    %58 = arith.subf %57, %53 : vector<16x2xf32>
    %59 = arith.mulf %58, %56 : vector<16x2xf32>
    %60 = vector.broadcast %20 : vector<16x1xf32> to vector<16x2xf32>
    %61 = arith.addf %60, %59 : vector<16x2xf32>
    %cst_34 = arith.constant dense<0.000000e+00> : vector<16x32xf32>
    %62 = tpu.matmul %56, %16, %cst_34 {dimension_numbers = #tpu.dot_dimension_numbers<[1], [0], [0], [1], [0, 0, 1, 1], [], []>} : vector<16x2xf32>, vector<2x32xf32>, vector<16x32xf32> -> vector<16x32xf32>
    %cst_35 = arith.constant dense<0.000000e+00> : vector<16x32xf32>
    %63 = tpu.matmul %61, %16, %cst_35 {dimension_numbers = #tpu.dot_dimension_numbers<[1], [0], [0], [1], [0, 0, 1, 1], [], []>} : vector<16x2xf32>, vector<2x32xf32>, vector<16x32xf32> -> vector<16x32xf32>
    %64 = arith.mulf %15, %62 : vector<16x32xf32>
    %65 = arith.addf %64, %63 : vector<16x32xf32>
    %cst_36 = arith.constant 2.000000e+01 : f32
    %66 = vector.broadcast %cst_36 : f32 to vector<16x32xf32>
    %67 = arith.minimumf %65, %66 : vector<16x32xf32>
    %68 = math.exp %67 : vector<16x32xf32>
    %cst_37 = arith.constant 2.000000e+00 : f32
    %69 = vector.broadcast %cst_37 : f32 to vector<16x32xf32>
    %70 = arith.addf %68, %69 : vector<16x32xf32>
    %71 = arith.mulf %68, %70 : vector<16x32xf32>
    %cst_38 = arith.constant 2.000000e+00 : f32
    %72 = vector.broadcast %cst_38 : f32 to vector<16x32xf32>
    %73 = arith.addf %71, %72 : vector<16x32xf32>
    %74 = tpu.reciprocal %73 {approx = true} : vector<16x32xf32> -> vector<16x32xf32>
    %75 = arith.mulf %73, %74 : vector<16x32xf32>
    %cst_39 = arith.constant 2.000000e+00 : f32
    %76 = vector.broadcast %cst_39 : f32 to vector<16x32xf32>
    %77 = arith.subf %76, %75 : vector<16x32xf32>
    %78 = arith.mulf %74, %77 : vector<16x32xf32>
    %79 = arith.mulf %71, %78 : vector<16x32xf32>
    %80 = arith.mulf %65, %79 : vector<16x32xf32>
    %c0_40 = arith.constant 0 : index
    %c0_41 = arith.constant 0 : index
    %81 = vector.load %arg9[%c0_40, %c0_41] : memref<16x32xf32, #tpu.memory_space<vmem>>, vector<16x32xf32>
    tpu.vector_store %arg9[%c0_40, %c0_41], %80 {strides = array<i32>} : memref<16x32xf32, #tpu.memory_space<vmem>>, vector<16x32xf32>,
    return
  }
  func.func @transform_0(%arg0: i32) -> (i32, i32) {
    %c0_i32 = arith.constant 0 : i32
    %c0_i32_0 = arith.constant 0 : i32
    return %c0_i32, %arg0 : i32, i32
  }
  func.func @transform_1(%arg0: i32) -> (i32, i32) {
    %c0_i32 = arith.constant 0 : i32
    %c0_i32_0 = arith.constant 0 : i32
    %c0_i32_1 = arith.constant 0 : i32
    return %c0_i32, %c0_i32_0 : i32, i32
  }
  func.func @transform_2(%arg0: i32) -> (i32, i32) {
    %c0_i32 = arith.constant 0 : i32
    %c0_i32_0 = arith.constant 0 : i32
    %c0_i32_1 = arith.constant 0 : i32
    return %c0_i32, %c0_i32_0 : i32, i32
  }
  func.func @transform_3(%arg0: i32) -> (i32, i32) {
    %c0_i32 = arith.constant 0 : i32
    %c0_i32_0 = arith.constant 0 : i32
    %c0_i32_1 = arith.constant 0 : i32
    return %c0_i32, %c0_i32_0 : i32, i32
  }
  func.func @transform_4(%arg0: i32) -> (i32, i32) {
    %c0_i32 = arith.constant 0 : i32
    %c0_i32_0 = arith.constant 0 : i32
    %c0_i32_1 = arith.constant 0 : i32
    return %c0_i32, %c0_i32_0 : i32, i32
  }
  func.func @transform_5(%arg0: i32) -> (i32, i32) {
    %c0_i32 = arith.constant 0 : i32
    %c0_i32_0 = arith.constant 0 : i32
    %c0_i32_1 = arith.constant 0 : i32
    return %c0_i32, %c0_i32_0 : i32, i32
  }
  func.func @transform_6(%arg0: i32) -> (i32, i32) {
    %c0_i32 = arith.constant 0 : i32
    %c0_i32_0 = arith.constant 0 : i32
    %c0_i32_1 = arith.constant 0 : i32
    return %c0_i32, %c0_i32_0 : i32, i32
  }
  func.func @transform_7(%arg0: i32) -> (i32, i32) {
    %c0_i32 = arith.constant 0 : i32
    %c0_i32_0 = arith.constant 0 : i32
    %c0_i32_1 = arith.constant 0 : i32
    return %c0_i32, %c0_i32_0 : i32, i32
  }
  func.func @transform_8(%arg0: i32) -> (i32, i32) {
    %c0_i32 = arith.constant 0 : i32
    %c0_i32_0 = arith.constant 0 : i32
    return %c0_i32, %arg0 : i32, i32
  }
}

</mosaic_0001>

<bundles_post_ra>
// kernel: tpu_custom_call.1
= control target key start
LH: loop header
LB: loop body
LE: loop exit
PB: predicated region body
PF: predicated region fallthrough
CT: control target
= control target key end

     0   :  { %s1064_s29 = smov 127   ;;  %v1065_v1 = vmov 0.0   ;;  %vm1066_vm0 = vmmov 0   ;;  %s1231_s0 = inlined_call_operand.vmem [shape: bf16[16,32], index: 0, kind: input, shape index: {}]   ;;  %s1232_s1 = inlined_call_operand.vmem [shape: bf16[16,48], index: 1, kind: input, shape index: {}]   ;;  %s1233_s2 = inlined_call_operand.vmem [shape: f32[16,3], index: 2, kind: input, shape index: {}]   ;;  %s1234_s3 = inlined_call_operand.vmem [shape: f32[2,32], index: 3, kind: input, shape index: {}]   ;;  %s1235_s4 = inlined_call_operand.vmem [shape: f32[32,2], index: 4, kind: input, shape index: {}]   ;;  %s1236_s5 = inlined_call_operand.vmem [shape: bf16[3,32], index: 5, kind: input, shape index: {}]   ;;  %s1237_s6 = inlined_call_operand.vmem [shape: f32[8,16], index: 6, kind: input, shape index: {}]   ;;  %s1238_s7 = inlined_call_operand.vmem [shape: f32[16,8], index: 7, kind: input, shape index: {}]   ;;  %s1239_s8 = inlined_call_operand.hbm [shape: f32[16,32], index: 8, kind: output, shape index: {}]  }
   0x1   :  { %v1030_v0 = vld [vmem:[%s1231_s0] sm:$0xff]   ;;  %949 = vmatprep.subr.bf16.mxu0 %v1065_v1  ;;  %955 = vmatprep.mubr.msk.bf16.mxu0 %vm1066_vm0, %v1065_v1  ;;  %v1128_v2 = vld [vmem:[%s1235_s4 + $0x18] sm:$0xff]  ;;  %v1134_v3 = vld [vmem:[%s1235_s4 + $0x10] sm:$0xff] }
   0x2   :  { %54 = vrot.lane.b32.xlu0 %v1030_v0, %s1064_s29  ;;  %959 = vmatprep.subr.mxu1 %v1128_v2 }
   0x3   :  { %13 = vsyncpa [#allocation3], 0  ;;  %960 = vmatpush3.msra.mxu1 %v1128_v2  ;;  %s1067_s0 = smov 1   ;;  %v49_v4 = vlaneseq  ;;  %v60_v6 = vld [vmem:[%s1236_s5] sm:$0x2]  ;;  %vm56_vm1 = vcmask 252928  }
   0x4   :  { %961 = vmatprep.subr.mxu1 %v1134_v3  ;;  %v62_v7 = vpack.i.b16 %v60_v6, %v60_v6  ;;  %v45_v9 = vld [vmem:[%s1236_s5] sm:$0x1]  ;;  %vm40_vm2 = vcmask 7168   ;;  %vm77_vm3 = vcmask 392192   ;;  %v124_v21 = vld [vmem:[%s1235_s4 + $0x8] sm:$0xff]  ;;  %v1068_v25 = vmov 0  }
   0x5   :  { %962 = vmatpush3.msra.mxu1 %v1134_v3  ;;  %v50_v5 = vshrl.u32 %v49_v4, 7  ;;  %v47_v12 = vpack.i.b16 %v45_v9, %v45_v9  ;;  %v1031_v20 = vld [vmem:[%s1232_s1] sm:$0xff]   ;;  %v1163_v23 = vld [vmem:[%s1233_s2 + $0x8] sm:$0xff]  ;;  %1025 = vset.pattern.permute.xlu1 %v1068_v25  ;;  %vm129_vm4 = vcmask 261120   ;;  %vm341_vm5 = vcmask 130048  }
   0x6   :  { %38 = vrot.lane.b32.xlu0 %v1030_v0, %s1067_s0  ;;  %963 = vmatprep.subr.mxu1 %v124_v21  ;;  %v123_v22 = vld [vmem:[%s1235_s4] sm:$0xff]  ;;  %v214_v26 = vmul.f32 2.0, %v1163_v23  ;;  %v325_v27 = vmul.f32 16.0, %v1163_v23  ;;  %v309_v30 = vmul.f32 %v1163_v23, %v1163_v23  ;;  %vm492_vm6 = vcmask 64512  }
   0x7   :  { %v66_v8 = vsub.s32 1, %v50_v5  ;;  %v51_v13 = vsub.s32 0, %v50_v5  ;;  %964 = vmatpush3.msra.mxu1 %v124_v21  ;;  %v1168_v24 = vld [vmem:[%s1233_s2] sm:$0xff]  ;;  %1026 = vset.pattern.permute.xlu0 %v1068_v25  ;;  %v1069_v60 = vmov 1   ;;  %v1070_v61 = vmov 2  }
   0x8   :  { %965 = vmatprep.subr.mxu1 %v123_v22  ;;  %v308_v28 = vmul.f32 %v1168_v24, %v1168_v24  ;;  %222 = vperm.xlu1 %1025, %v214_v26   ;;  %v213_v29 = vmul.f32 2.0, %v1168_v24  ;;  %v311_v32 = vmul.f32 16.0, %v309_v30  ;;  %v324_v33 = vmul.f32 16.0, %v1168_v24  ;;  %v338_v49 = vld [vmem:[%s1237_s6] sm:$0xff] }
   0x9   :  { %v67_v10 = vrot.slane %v62_v7, %v66_v8  ;;  %v52_v16 = vrot.slane %v47_v12, %v51_v13  ;;  %966 = vmatpush3.msra.mxu1 %v123_v22  ;;  %v339_v59 = vld [vmem:[%s1238_s7] sm:$0xff]  ;;  %vm690_vm7 = vcmask 1041408   ;;  %vm683_vm8 = vcmask 15360  }
   0xa   :  { %970 = vmatprep.subr.mxu1 %v1128_v2  ;;  %333 = vperm.xlu0 %1026, %v325_v27   ;;  %v310_v31 = vmul.f32 16.0, %v308_v28 }
   0xc   :  { %217 = vperm.xlu1 %1025, %v213_v29  }
   0xe   :  { %314 = vperm.xlu0 %1026, %v310_v31  }
  0x10   :  { %319 = vperm.xlu1 %1025, %v311_v32  }
  0x12   :  { %662 = vperm.xlu0 %1026, %v1168_v24  }
  0x14   :  { %328 = vperm.xlu1 %1025, %v324_v33  }
  0x16   :  { %666 = vperm.xlu0 %1026, %v1163_v23  }
  0x18   :  { %1027 = vset.pattern.permute.xlu1 %v1069_v60 }
  0x19   :  { %651 = vperm.xlu1 %1027, %v1168_v24  }
  0x1a   :  { %1029 = vset.pattern.permute.xlu0 %v1070_v61 }
  0x1b   :  { %678 = vperm.xlu0 %1029, %v1163_v23  }
  0x1d   :  { %656 = vperm.xlu1 %1027, %v1163_v23  }
  0x21   :  { %1028 = vset.pattern.permute.xlu1 %v1070_v61 }
  0x22   :  { %674 = vperm.xlu1 %1028, %v1168_v24  }
  0x74   :  { %v55_v11 = vpop.permute.xlu0 %54 }
  0x75   :  { %v58_v14 = vsel %vm56_vm1, %v55_v11, 0 }
  0x76   :  { %v68_v15 = vmul.bf16 %v67_v10, %v58_v14  ;;  %v122_v10 = vld [vmem:[%s1234_s3] sm:$0x3]  ;;  %s1071_s3 = smov [#allocation2]  }
  0x77   :  { %s885_s28 = sshll.u32 %s1071_s3, 4  ;;  %s886_s28 = int_to_ptr.vmem [resolvable:$true] %s885_s28 }
  0x78   :  { %950 = vmatpush3.bf16.msra.mxu0 %v68_v15  ;;  %v39_v17 = vpop.permute.xlu0 %38  ;;  %s1042_s29 = scalar_lea.vmem %s886_s28, 256  ;;  %p1047_p1 = scmp.lt.s32.totalorder %s886_s28, %s886_s28 }
  0x79   :  { %951 = vmatprep.subr.bf16.mxu0 %v1065_v1  ;;  %v43_v18 = vsel %vm40_vm2, 0, %v39_v17  ;;  %p1043_p0 = scmp.ne.s32.totalorder %s886_s28, %s1042_s29  ;;  %p1048_p2 = scmp.lt.s32.totalorder %s1042_s29, %s1042_s29 }
  0x7a   :  { %v53_v19 = vmul.bf16 %v52_v16, %v43_v18 }
  0x7b   :  { %p1049_p3 = por %p1048_p2, %p1047_p1 }
  0x7c   :  { %952 = vmatpush3.bf16.msra.mxu0 %v1030_v0  ;;  %v340_v0 = vld [vmem:[%s1238_s7 + $0x8] sm:$0xff] }
  0x7d   :  { %953 = vmatprep.subr.bf16.mxu0 %v1065_v1  ;;  %p1050_p4 = pnand %p1049_p3, %p1043_p0 }
  0x80   :  { %954 = vmatpush3.bf16.msra.mxu0 %v53_v19 }
  0x81   :  { %981 = vmatprep.subr.mxu0 %v1065_v1 }
  0x83   :  { %956 = vmatmul.mubr.msk.bf16.vlgmr.msra.gmra.mxu0 %vm77_vm3, %v1031_v20  ;;  %v223_v40 = vpop.permute.xlu1 %222 }
  0x84   :  { %985 = vmatprep.mubr.msk.f32.mxu0 %vm1066_vm0, %v1065_v1 }
  0x85   :  { %v334_v43 = vpop.permute.xlu0 %333 }
  0x87   :  { %v218_v41 = vpop.permute.xlu1 %217 }
  0x89   :  { %v315_v57 = vpop.permute.xlu0 %314 }
  0x8b   :  { %v320_v42 = vpop.permute.xlu1 %319 }
  0x8d   :  { %v663_v12 = vpop.permute.xlu0 %662 }
  0x8f   :  { %v329_v46 = vpop.permute.xlu1 %328 }
  0x91   :  { %v667_v17 = vpop.permute.xlu0 %666 }
  0x94   :  { %v652_v11 = vpop.permute.xlu1 %651 }
  0x96   :  { %v679_v25 = vpop.permute.xlu0 %678 }
  0x98   :  { %v657_v14 = vpop.permute.xlu1 %656 }
  0x9d   :  { %v675_v24 = vpop.permute.xlu1 %674 }
 0x143   :  { %v1180_v34 = vpop.f32.mrf.mxu0 }
 0x144   :  { %967 = vmatprep.mubr.msk.f32.mxu1 %vm129_vm4, %v1180_v34  ;;  %v211_v36 = vmul.f32 %v1180_v34, %v1180_v34 }
 0x145   :  { %v957_v35 = vpop.f32.mrf.mxu0 }
 0x147   :  { %v1186_v37 = vpop.f32.mrf.mxu0 }
 0x148   :  { %968 = vmatmul.mubr.msk.f32.vlgmr.msra.gmra.mxu1 %vm129_vm4, %v1186_v37  ;;  %v212_v39 = vmul.f32 %v1186_v37, %v1186_v37 }
 0x149   :  { %971 = vmatpush3.msra.mxu1 %v1128_v2  ;;  %v958_v38 = vpop.f32.mrf.mxu0  ;;  %978 = vmatprep.mubr.msk.f32.mxu1 %vm129_vm4, %v211_v36 }
 0x14a   :  { %972 = vmatprep.subr.mxu1 %v1134_v3 }
 0x14b   :  { %973 = vmatpush3.msra.mxu1 %v1134_v3 }
 0x14c   :  { %974 = vmatprep.subr.mxu1 %v124_v21 }
 0x14d   :  { %975 = vmatpush3.msra.mxu1 %v124_v21 }
 0x14e   :  { %976 = vmatprep.subr.mxu1 %v123_v22 }
 0x14f   :  { %977 = vmatpush3.msra.mxu1 %v123_v22 }
 0x150   :  { %979 = vmatmul.mubr.msk.f32.vlgmr.msra.gmra.mxu1 %vm129_vm4, %v212_v39  ;;  %988 = vmatprep.subr.mxu1 %v1065_v1 }
 0x151   :  { %992 = vmatprep.mubr.msk.f32.mxu1 %vm1066_vm0, %v1065_v1 }
 0x208   :  { %v969_v44 = vpop.f32.mrf.mxu1 }
 0x209   :  { %v337_v45 = vadd.f32 %v969_v44, %v334_v43  ;;  %v226_v50 = vmul.f32 %v969_v44, %v223_v40 }
 0x20a   :  { %v202_v47 = vpop.f32.mrf.mxu1 }
 0x20b   :  { %v336_v48 = vadd.f32 %v329_v46, %v202_v47  ;;  %982 = vmatpush3.msra.mxu0 %v337_v45  ;;  %v225_v52 = vmul.f32 %v218_v41, %v202_v47 }
 0x20c   :  { %983 = vmatprep.subr.mxu0 %v1065_v1 }
 0x20d   :  { %984 = vmatpush3.msra.mxu0 %v336_v48 }
 0x20e   :  { %986 = vmatmul.mubr.msk.f32.vlgmr.msra.gmra.mxu0 %vm341_vm5, %v338_v49 }
 0x20f   :  { %997 = vmatprep.mubr.msk.f32.mxu0 %vm492_vm6, %v339_v59 }
 0x210   :  { %v980_v51 = vpop.f32.mrf.mxu1 }
 0x211   :  { %v305_v53 = vadd.f32 %v980_v51, %v226_v50 }
 0x212   :  { %v299_v54 = vpop.f32.mrf.mxu1 }
 0x213   :  { %v323_v55 = vadd.f32 %v320_v42, %v305_v53  ;;  %v300_v56 = vadd.f32 %v299_v54, %v225_v52 }
 0x215   :  { %v322_v58 = vadd.f32 %v315_v57, %v300_v56  ;;  %989 = vmatpush3.msra.mxu1 %v323_v55 }
 0x216   :  { %990 = vmatprep.subr.mxu1 %v1065_v1 }
 0x217   :  { %991 = vmatpush3.msra.mxu1 %v322_v58 }
 0x218   :  { %993 = vmatmul.mubr.msk.f32.vlgmr.msra.gmra.mxu1 %vm341_vm5, %v338_v49 }
 0x219   :  { %1002 = vmatprep.mubr.msk.f32.mxu1 %vm492_vm6, %v339_v59 }
 0x2ce   :  { %v411_v62 = vpop.f32.mrf.mxu0 }
 0x2cf   :  { %v415_v63 = vmul.f32 0.03125, %v411_v62 }
 0x2d0   :  { %v987_v1 = vpop.f32.mrf.mxu0 }
 0x2d1   :  { %995 = vmatprep.subr.mxu0 %v415_v63  ;;  %v487_v2 = vmul.f32 %v415_v63, %v415_v63 }
 0x2d2   :  { %996 = vmatpush3.msra.mxu0 %v415_v63 }
 0x2d3   :  { %998 = vmatmul.mubr.msk.f32.vlgmr.msra.gmra.mxu0 %vm492_vm6, %v340_v0  ;;  %1005 = vmatprep.subr.msk.mxu0 %vm690_vm7, %v122_v10 }
 0x2d4   :  { %1006 = vmatpush3.msk.msra.mxu0 %vm690_vm7, %v122_v10 }
 0x2d8   :  { %v482_v3 = vpop.f32.mrf.mxu1 }
 0x2d9   :  { %v486_v4 = vmul.f32 0.03125, %v482_v3 }
 0x2da   :  { %v994_v5 = vpop.f32.mrf.mxu1 }
 0x2db   :  { %v488_v6 = vsub.f32 %v486_v4, %v487_v2 }
 0x2dd   :  { %v489_v7 = vmax.f32 %v488_v6, 0.0 }
 0x2df   :  { %v490_v8 = vadd.f32 1e-05, %v489_v7 }
 0x2e1   :  { %1032 = vrsqrt.f32 %v490_v8 }
 0x2ee   :  { %v1033_v9 = vpop.eup %1032 }
 0x2ef   :  { %1000 = vmatprep.subr.mxu1 %v1033_v9 }
 0x2f0   :  { %1001 = vmatpush3.msra.mxu1 %v1033_v9 }
 0x2f1   :  { %1003 = vmatmul.mubr.msk.f32.vlgmr.msra.gmra.mxu1 %vm492_vm6, %v340_v0  ;;  %1010 = vmatprep.subr.msk.mxu1 %vm690_vm7, %v122_v10 }
 0x2f2   :  { %1011 = vmatpush3.msk.msra.mxu1 %vm690_vm7, %v122_v10 }
 0x393   :  { %v999_v13 = vpop.f32.mrf.mxu0 }
 0x394   :  { %v670_v19 = vsub.f32 %v667_v17, %v999_v13 }
 0x395   :  { %v565_v15 = vpop.f32.mrf.mxu0 }
 0x396   :  { %v669_v21 = vsub.f32 %v663_v12, %v565_v15 }
 0x3b1   :  { %v1004_v16 = vpop.f32.mrf.mxu1 }
 0x3b2   :  { %v660_v18 = vmul.f32 %v1004_v16, %v657_v14 }
 0x3b3   :  { %v640_v20 = vpop.f32.mrf.mxu1 }
 0x3b4   :  { %v659_v22 = vmul.f32 %v652_v11, %v640_v20  ;;  %v672_v23 = vmul.f32 %v670_v19, %v660_v18 }
 0x3b6   :  { %1007 = vmatprep.mubr.msk.f32.mxu0 %vm683_vm8, %v659_v22  ;;  %v671_v26 = vmul.f32 %v669_v21, %v659_v22  ;;  %v682_v28 = vadd.f32 %v679_v25, %v672_v23 }
 0x3b7   :  { %1008 = vmatmul.mubr.msk.f32.vlgmr.msra.gmra.mxu0 %vm683_vm8, %v660_v18 }
 0x3b8   :  { %v681_v27 = vadd.f32 %v675_v24, %v671_v26 }
 0x3ba   :  { %1012 = vmatprep.mubr.msk.f32.mxu1 %vm683_vm8, %v681_v27 }
 0x3bb   :  { %1013 = vmatmul.mubr.msk.f32.vlgmr.msra.gmra.mxu1 %vm683_vm8, %v682_v28 }
 0x477   :  { %v1009_v29 = vpop.f32.mrf.mxu0 }
 0x478   :  { %v851_v31 = vmul.f32 %v1009_v29, %v1186_v37 }
 0x479   :  { %v760_v30 = vpop.f32.mrf.mxu0 }
 0x47a   :  { %v850_v33 = vmul.f32 %v760_v30, %v1180_v34 }
 0x47b   :  { %v1014_v32 = vpop.f32.mrf.mxu1 }
 0x47c   :  { %v853_v35 = vadd.f32 %v1014_v32, %v851_v31 }
 0x47d   :  { %v841_v36 = vpop.f32.mrf.mxu1 }
 0x47e   :  { %v855_v38 = vmin.f32 %v853_v35, 20.0  ;;  %v852_v39 = vadd.f32 %v850_v33, %v841_v36 }
 0x480   :  { %v858_v40 = vmul.f32 1.442695, %v855_v38  ;;  %v854_v41 = vmin.f32 %v852_v39, 20.0 }
 0x482   :  { %1034 = vpow2.f32 %v858_v40  ;;  %v856_v42 = vmul.f32 1.442695, %v854_v41 }
 0x484   :  { %1036 = vpow2.f32 %v856_v42 }
 0x48f   :  { %v1035_v43 = vpop.eup %1034 }
 0x490   :  { %v861_v44 = vadd.f32 2.0, %v1035_v43 }
 0x491   :  { %v1037_v45 = vpop.eup %1036 }
 0x492   :  { %v863_v46 = vmul.f32 %v1035_v43, %v861_v44  ;;  %v860_v47 = vadd.f32 2.0, %v1037_v45 }
 0x494   :  { %v865_v48 = vadd.f32 2.0, %v863_v46  ;;  %v862_v49 = vmul.f32 %v1037_v45, %v860_v47 }
 0x496   :  { %1038 = vrcp.f32 %v865_v48  ;;  %v864_v37 = vadd.f32 2.0, %v862_v49 }
 0x498   :  { %1040 = vrcp.f32 %v864_v37 }
 0x4a3   :  { %v1039_v34 = vpop.eup %1038 }
 0x4a4   :  { %v869_v50 = vmul.f32 %v1039_v34, %v865_v48 }
 0x4a5   :  { %v1041_v51 = vpop.eup %1040 }
 0x4a6   :  { %v871_v52 = vsub.f32 2.0, %v869_v50  ;;  %v868_v53 = vmul.f32 %v1041_v51, %v864_v37 }
 0x4a8   :  { %v873_v54 = vmul.f32 %v1039_v34, %v871_v52  ;;  %v870_v55 = vsub.f32 2.0, %v868_v53 }
 0x4aa   :  { %v875_v56 = vmul.f32 %v873_v54, %v863_v46  ;;  %v872_v57 = vmul.f32 %v1041_v51, %v870_v55 }
 0x4ac   :  { %v877_v58 = vmul.f32 %v875_v56, %v853_v35  ;;  %v874_v59 = vmul.f32 %v872_v57, %v862_v49 }
 0x4ae   :  { %879 = vst.msk [vmem:[#allocation2 + $0x8] sm:$0xff] %vm129_vm4, %v877_v58  ;;  %v876_v60 = vmul.f32 %v874_v59, %v852_v39 }
 0x4b0   :  { %878 = vst.msk [vmem:[#allocation2] sm:$0xff] %vm129_vm4, %v876_v60 }
 0x4b1   :  { %1053 = shalt.err (!%p1050_p4)
}
 0x4b2   :  { %s1072_s30 = smov 128   ;;  %s1073_s9 = smov 8  }
 0x4b3   :  { %891 = dma.vmem_to_hbm [thread:$0]  %s886_s28, 256, %s1239_s8, [#allocation3], %s1072_s30, %s1072_s30, %s1073_s9  }
 0x4b4   :  { %1062 = dma.done.wait [#allocation3], 256  }
 0x4b5   :  { %1063 = vsyncadd [#allocation3], 4294967040 }
 0x4b6   :  { %895 = vsyncpa [#allocation3], 1 }

</bundles_post_ra>
